<compile_context>
chip_gen: v6e
topology: v6e:2x2x1
jax: 0.10.0
libtpu: 0.0.40
codegen_flags: <defaults>
</compile_context>

<pallas_src>
import jax
import jax.numpy as jnp
from jax.experimental import pallas as pl
from jax.experimental.pallas import tpu as pltpu

N_STATES = 5
HIDDEN = 15
N_ACTIONS = 3

PAD_IN = 8            # N_STATES (5) + constant-1 bias lane, padded to a sublane multiple
PAD_H = 128           # hidden / output features padded to one full lane width
ONES_COL = N_STATES   # column 5 of the padded input holds the constant 1.0
ONES_LANE = HIDDEN    # lane 15 of h1 / h2 is forced to 1.0 (carries the next bias)

MAX_BATCH_TILE = 1024  # per-grid-step batch tile (<<3 MiB VMEM even double-buffered)

# Row layout of the packed parameter slab (lanes = 128 wide, zeros in all pads).
# Biases are folded into the weight rows -- no separate bias rows.
R_W1 = 0               # rows [  0,   8): W1 (5x15) in [0:5,0:15]; row 5 = b1, [5,15]=1.0
R_W2 = R_W1 + PAD_IN   # rows [  8, 136): W2 (15x15) in [+0:+15,0:15]; row +15 = b2, [+15,15]=1.0
R_W3 = R_W2 + PAD_H    # rows [136, 264): W3 (15x3) in [+0:+15,0:3];  row +15 = b3
P_ROWS = R_W3 + PAD_H  # 264 (multiple of 8)
P_COLS = PAD_H         # 128


def _mlp_argmax_kernel(x_ref, p_ref, q_ref, a_ref):
    x = x_ref[...]                                    # (TB, 8); col 5 == 1.0 (bias lane)
    # Static, tile-aligned views into the packed slab (zero-cost slicing).
    w1 = p_ref[R_W1:R_W1 + PAD_IN, :]                 # (8, 128)
    w2 = p_ref[R_W2:R_W2 + PAD_H, :]                  # (128, 128)
    w3 = p_ref[R_W3:R_W3 + PAD_H, :]                  # (128, 128)

    # Biases ride the matmul via the constant-1 lane -> no VPU broadcast-adds.
    h1 = jnp.maximum(jnp.dot(x, w1, preferred_element_type=jnp.float32), 0.0)
    h2 = jnp.maximum(jnp.dot(h1, w2, preferred_element_type=jnp.float32), 0.0)
    q = jnp.dot(h2, w3, preferred_element_type=jnp.float32)   # (TB, 128); lanes >= 3 are 0

    # Narrow (TB, 3) Q writeback -- no 128-lane HBM write amplification.
    q_ref[...] = q[:, :N_ACTIONS].astype(q_ref.dtype)

    # Fused greedy action selection: first-argmax over the 3 real lanes,
    # expressed with max/min lane-reductions (robust Mosaic lowering).
    lane = jax.lax.broadcasted_iota(jnp.int32, q.shape, 1)    # (TB, 128)
    valid = lane < N_ACTIONS
    qm = jnp.where(valid, q, -jnp.inf)
    qmax = jnp.max(qm, axis=-1, keepdims=True)                # (TB, 1)
    first_hit = jnp.where(valid & (qm == qmax), lane, PAD_H)
    a_ref[...] = jnp.min(first_hit, axis=-1, keepdims=True)   # (TB, 1) int32


def _round_up(n, m):
    return ((n + m - 1) // m) * m


def pad_states(x):
    """One-time conversion of raw (B, 5) states into the padded MXU layout.

    In an RL loop this is done once when states enter the replay buffer, so the
    per-forward hot path pays no pad/slice XLA ops. Column 5 is the constant-1
    bias lane; columns 6..7 and padded batch rows are zero.
    """
    B = x.shape[0]
    b_pad = _round_up(B, 8)
    xp = jnp.zeros((b_pad, PAD_IN), jnp.float32)
    xp = xp.at[:, ONES_COL].set(1.0)
    xp = xp.at[:B, :N_STATES].set(x)
    return xp


def net_forward_padded(x_pad, packed_params):
    """Fast path. x_pad: (b_pad, 8) float32, b_pad % 8 == 0, bias lane preset.
    Returns (q, actions): (b_pad, 3) float32 Q-values and (b_pad, 1) int32
    greedy actions, with zero wrapper-side XLA ops for batches <= 1024."""
    b = x_pad.shape[0]
    assert b % 8 == 0 and x_pad.shape[1] == PAD_IN

    # Adaptive batch tile: one grid step for anything <= MAX_BATCH_TILE,
    # otherwise the fewest near-equal 8-aligned tiles (minimal dead rows).
    n_tiles = max(1, -(-b // MAX_BATCH_TILE))
    tb = _round_up(-(-b // n_tiles), 8)
    b_grid = tb * n_tiles
    if b_grid != b:  # only for large, unevenly-sized batches
        x_pad = jnp.zeros((b_grid, PAD_IN), x_pad.dtype).at[:b].set(x_pad)

    q, act = pl.pallas_call(
        _mlp_argmax_kernel,
        out_shape=(
            jax.ShapeDtypeStruct((b_grid, N_ACTIONS), jnp.float32),
            jax.ShapeDtypeStruct((b_grid, 1), jnp.int32),
        ),
        grid=(n_tiles,),
        in_specs=[
            pl.BlockSpec((tb, PAD_IN), lambda i: (i, 0)),        # batch-tiled states
            pl.BlockSpec((P_ROWS, P_COLS), lambda i: (0, 0)),    # VMEM-resident params
        ],
        out_specs=(
            pl.BlockSpec((tb, N_ACTIONS), lambda i: (i, 0)),     # narrow Q block
            pl.BlockSpec((tb, 1), lambda i: (i, 0)),             # fused argmax actions
        ),
        compiler_params=pltpu.CompilerParams(
            # Only meaningful when the batch splits into >= 2 tiles (v7x 2-TC);
            # with a single grid step it is a no-op, so it costs nothing here.
            dimension_semantics=("parallel",)),
    )(x_pad, packed_params)

    if b_grid != b:
        q, act = q[:b], act[:b]
    return q, act


def net_forward(x, packed_params):
    """Drop-in equivalent of Net.forward: x (B, 5) float32 -> (B, 3) Q-values."""
    B = x.shape[0]
    q, _ = net_forward_padded(pad_states(x), packed_params)
    return q if q.shape[0] == B else q[:B]


def init_params(key):
    """Deterministic init mirroring the PyTorch module:
       weights ~ Normal(0, 0.1); biases use Linear's default uniform init."""
    ks = jax.random.split(key, 6)

    def linear(kw, kb, fan_in, fan_out):
        # torch weight shape is (out, in); we store transposed (in, out).
        w = (jax.random.normal(kw, (fan_out, fan_in), jnp.float32) * 0.1).T
        bound = 1.0 / jnp.sqrt(jnp.float32(fan_in))
        b = jax.random.uniform(kb, (fan_out,), jnp.float32, -bound, bound)
        return w, b

    w1, b1 = linear(ks[0], ks[1], N_STATES, HIDDEN)
    w2, b2 = linear(ks[2], ks[3], HIDDEN, HIDDEN)
    w3, b3 = linear(ks[4], ks[5], HIDDEN, N_ACTIONS)
    return {"w1": w1, "b1": b1, "w2": w2, "b2": b2, "w3": w3, "b3": b3}


def pack_params(params):
    """Pack weights + folded biases into one (264, 128) zero-padded f32 slab (done once)."""
    p = jnp.zeros((P_ROWS, P_COLS), jnp.float32)
    # fc1: W1 rows 0..4, b1 in row 5 (multiplied by the input's constant-1 lane);
    #      [row 5, lane 15] = 1.0 keeps the constant-1 alive in h1 for fc2's bias.
    p = p.at[R_W1:R_W1 + N_STATES, 0:HIDDEN].set(params["w1"])
    p = p.at[R_W1 + ONES_COL, 0:HIDDEN].set(params["b1"])
    p = p.at[R_W1 + ONES_COL, ONES_LANE].set(1.0)
    # fc2: W2 rows +0..+14, b2 in row +15; [row +15, lane 15] = 1.0 keeps it alive in h2.
    p = p.at[R_W2:R_W2 + HIDDEN, 0:HIDDEN].set(params["w2"])
    p = p.at[R_W2 + ONES_LANE, 0:HIDDEN].set(params["b2"])
    p = p.at[R_W2 + ONES_LANE, ONES_LANE].set(1.0)
    # out: W3 rows +0..+14, b3 in row +15.
    p = p.at[R_W3:R_W3 + HIDDEN, 0:N_ACTIONS].set(params["w3"])
    p = p.at[R_W3 + ONES_LANE, 0:N_ACTIONS].set(params["b3"])
    return p


if __name__ == "__main__":
    key = jax.random.PRNGKey(0)
    pkey, xkey = jax.random.split(key)

    params = init_params(pkey)
    packed = pack_params(params)            # one-time packing (kept across RL steps)

    batch = 8
    x = jax.random.normal(xkey, (batch, N_STATES), jnp.float32)

    # Fast RL path: states kept in the padded layout; a single pallas_call
    # returns both Q-values and the greedy action, no wrapper pad/slice ops.
    x_pad = pad_states(x)                   # (8, 8), done once per state batch
    q, act = net_forward_padded(x_pad, packed)
    jax.block_until_ready((q, act))

    # Pure-JAX reference of the same math (unpadded parameters).
    h1 = jnp.maximum(x @ params["w1"] + params["b1"][None, :], 0.0)
    h2 = jnp.maximum(h1 @ params["w2"] + params["b2"][None, :], 0.0)
    ref_q = h2 @ params["w3"] + params["b3"][None, :]
    ref_act = jnp.argmax(ref_q, axis=1)

    assert q.shape == (batch, N_ACTIONS) and act.shape == (batch, 1)
    assert jnp.allclose(q, ref_q, atol=1e-5, rtol=1e-5)
    assert jnp.array_equal(act[:, 0], ref_act.astype(act.dtype))

    # Torch-signature convenience wrapper (matches Net.forward exactly).
    q2 = net_forward(x, packed)
    jax.block_until_ready(q2)
    assert jnp.allclose(q2, ref_q, atol=1e-5, rtol=1e-5)

    print("KERNEL_OK")
</pallas_src>

<mosaic_0001>
module attributes {stable_mosaic.version = 11 : i64} {
  func.func @_mlp_argmax_kernel(%arg0: i32, %arg1: memref<8x8xf32, #tpu.memory_space<vmem>>, %arg2: memref<264x128xf32, #tpu.memory_space<vmem>>, %arg3: memref<8x3xf32, #tpu.memory_space<vmem>>, %arg4: memref<8x1xi32, #tpu.memory_space<vmem>>) attributes {dimension_semantics = [#tpu.dimension_semantics<parallel>], iteration_bounds = array<i64: 1>, scalar_prefetch = 0 : i64, scratch_operands = 0 : i64, tpu.core_type = #tpu.core_type<tc>, window_params = [{transform_indices = @transform_0, window_bounds = array<i64: 8, 8>}, {pipeline_mode = #tpu.pipeline_mode<synchronous>, transform_indices = @transform_1, window_bounds = array<i64: 264, 128>}, {transform_indices = @transform_2, window_bounds = array<i64: 8, 3>}, {transform_indices = @transform_3, window_bounds = array<i64: 8, 1>}]} {
    %c0 = arith.constant 0 : index
    %c0_0 = arith.constant 0 : index
    %0 = vector.load %arg1[%c0, %c0_0] : memref<8x8xf32, #tpu.memory_space<vmem>>, vector<8x8xf32>
    %c0_1 = arith.constant 0 : index
    %c0_2 = arith.constant 0 : index
    %1 = vector.load %arg2[%c0_1, %c0_2] : memref<264x128xf32, #tpu.memory_space<vmem>>, vector<8x128xf32>
    %c8 = arith.constant 8 : index
    %c0_3 = arith.constant 0 : index
    %2 = vector.load %arg2[%c8, %c0_3] : memref<264x128xf32, #tpu.memory_space<vmem>>, vector<128x128xf32>
    %c136 = arith.constant 136 : index
    %c0_4 = arith.constant 0 : index
    %3 = vector.load %arg2[%c136, %c0_4] : memref<264x128xf32, #tpu.memory_space<vmem>>, vector<128x128xf32>
    %cst = arith.constant dense<0.000000e+00> : vector<8x128xf32>
    %4 = tpu.matmul %0, %1, %cst {dimension_numbers = #tpu.dot_dimension_numbers<[1], [0], [0], [1], [0, 0, 1, 1], [], []>} : vector<8x8xf32>, vector<8x128xf32>, vector<8x128xf32> -> vector<8x128xf32>
    %cst_5 = arith.constant 0.000000e+00 : f32
    %5 = vector.broadcast %cst_5 : f32 to vector<8x128xf32>
    %6 = arith.maximumf %4, %5 : vector<8x128xf32>
    %cst_6 = arith.constant dense<0.000000e+00> : vector<8x128xf32>
    %7 = tpu.matmul %6, %2, %cst_6 {dimension_numbers = #tpu.dot_dimension_numbers<[1], [0], [0], [1], [0, 0, 1, 1], [], []>} : vector<8x128xf32>, vector<128x128xf32>, vector<8x128xf32> -> vector<8x128xf32>
    %cst_7 = arith.constant 0.000000e+00 : f32
    %8 = vector.broadcast %cst_7 : f32 to vector<8x128xf32>
    %9 = arith.maximumf %7, %8 : vector<8x128xf32>
    %cst_8 = arith.constant dense<0.000000e+00> : vector<8x128xf32>
    %10 = tpu.matmul %9, %3, %cst_8 {dimension_numbers = #tpu.dot_dimension_numbers<[1], [0], [0], [1], [0, 0, 1, 1], [], []>} : vector<8x128xf32>, vector<128x128xf32>, vector<8x128xf32> -> vector<8x128xf32>
    %11 = vector.extract_strided_slice %10 {offsets = [0, 0], sizes = [8, 3], strides = [1, 1]} : vector<8x128xf32> to vector<8x3xf32>
    %c0_9 = arith.constant 0 : index
    %c0_10 = arith.constant 0 : index
    %12 = vector.load %arg3[%c0_9, %c0_10] : memref<8x3xf32, #tpu.memory_space<vmem>>, vector<8x3xf32>
    tpu.vector_store %arg3[%c0_9, %c0_10], %11 {strides = array<i32>} : memref<8x3xf32, #tpu.memory_space<vmem>>, vector<8x3xf32>,
    %13 = tpu.iota {dimensions = array<i32: 1>} : vector<8x128xi32>
    %c3_i32 = arith.constant 3 : i32
    %14 = vector.broadcast %c3_i32 : i32 to vector<8x128xi32>
    %15 = arith.cmpi slt, %13, %14 : vector<8x128xi32>
    %cst_11 = arith.constant 0xFF800000 : f32
    %16 = vector.broadcast %cst_11 : f32 to vector<8x128xf32>
    %17 = arith.select %15, %10, %16 : vector<8x128xi1>, vector<8x128xf32>
    %cst_12 = arith.constant dense<0xFF800000> : vector<8xf32>
    %18 = vector.multi_reduction <maximumf>, %17, %cst_12 [1] : vector<8x128xf32> to vector<8xf32>
    %19 = vector.shape_cast %18 : vector<8xf32> to vector<8x1xf32>
    %20 = vector.broadcast %19 : vector<8x1xf32> to vector<8x128xf32>
    %21 = arith.cmpf oeq, %17, %20 : vector<8x128xf32>
    %22 = arith.andi %15, %21 : vector<8x128xi1>
    %c128_i32 = arith.constant 128 : i32
    %23 = vector.broadcast %c128_i32 : i32 to vector<8x128xi32>
    %24 = arith.select %22, %13, %23 : vector<8x128xi1>, vector<8x128xi32>
    %cst_13 = arith.constant dense<2147483647> : vector<8xi32>
    %25 = vector.multi_reduction <minsi>, %24, %cst_13 [1] : vector<8x128xi32> to vector<8xi32>
    %26 = vector.shape_cast %25 : vector<8xi32> to vector<8x1xi32>
    %c0_14 = arith.constant 0 : index
    %c0_15 = arith.constant 0 : index
    %27 = vector.load %arg4[%c0_14, %c0_15] : memref<8x1xi32, #tpu.memory_space<vmem>>, vector<8x1xi32>
    tpu.vector_store %arg4[%c0_14, %c0_15], %26 {strides = array<i32>} : memref<8x1xi32, #tpu.memory_space<vmem>>, vector<8x1xi32>,
    return
  }
  func.func @transform_0(%arg0: i32) -> (i32, i32) {
    %c0_i32 = arith.constant 0 : i32
    %c0_i32_0 = arith.constant 0 : i32
    return %arg0, %c0_i32 : i32, i32
  }
  func.func @transform_1(%arg0: i32) -> (i32, i32) {
    %c0_i32 = arith.constant 0 : i32
    %c0_i32_0 = arith.constant 0 : i32
    %c0_i32_1 = arith.constant 0 : i32
    return %c0_i32, %c0_i32_0 : i32, i32
  }
  func.func @transform_2(%arg0: i32) -> (i32, i32) {
    %c0_i32 = arith.constant 0 : i32
    %c0_i32_0 = arith.constant 0 : i32
    return %arg0, %c0_i32 : i32, i32
  }
  func.func @transform_3(%arg0: i32) -> (i32, i32) {
    %c0_i32 = arith.constant 0 : i32
    %c0_i32_0 = arith.constant 0 : i32
    return %arg0, %c0_i32 : i32, i32
  }
}

</mosaic_0001>

<bundles_post_ra>
// kernel: tpu_custom_call.1
= control target key start
LH: loop header
LB: loop body
LE: loop exit
PB: predicated region body
PF: predicated region fallthrough
CT: control target
= control target key end

     0   :  { %9 = vsyncpa [#allocation3], 0  ;;  %s565_s0 = inlined_call_operand.hbm [shape: f32[8,8], index: 0, kind: input, shape index: {}]   ;;  %s566_s1 = inlined_call_operand.hbm [shape: f32[264,128], index: 1, kind: input, shape index: {}]   ;;  %s567_s2 = inlined_call_operand.vmem [shape: f32[8,3], index: 2, kind: output, shape index: {0}]   ;;  %s568_s3 = inlined_call_operand.vmem [shape: s32[8,1], index: 3, kind: output, shape index: {1}]  }
   0x1   :  { %10 = vsyncpa [#allocation5], 0  ;;  %s488_s12 = smov [#allocation2]   ;;  %s489_s14 = smov [#allocation4]  }
   0x2   :  { %s17_s13 = sshll.u32 %s488_s12, 4  ;;  %s26_s15 = sshll.u32 %s489_s14, 4  ;;  %s18_s13 = int_to_ptr.vmem [resolvable:$true] %s17_s13  ;;  %s27_s15 = int_to_ptr.vmem [resolvable:$true] %s26_s15 }
   0x3   :  { %s452_s16 = scalar_lea.vmem %s18_s13, 128  ;;  %p457_p1 = scmp.lt.s32.totalorder %s18_s13, %s18_s13 }
   0x4   :  { %p453_p0 = scmp.ne.s32.totalorder %s18_s13, %s452_s16  ;;  %p458_p2 = scmp.lt.s32.totalorder %s452_s16, %s452_s16 }
   0x6   :  { %p459_p3 = por %p458_p2, %p457_p1 }
   0x8   :  { %p460_p4 = pnand %p459_p3, %p453_p0 }
   0xa   :  { %463 = shalt.err (!%p460_p4)
}
   0xb   :  { %20 = dma.hbm_to_vmem [thread:$0]  %s565_s0, 128, %s18_s13, [#allocation3]  }
   0xc   :  { %s472_s19 = scalar_lea.vmem %s27_s15, 4224  ;;  %p477_p6 = scmp.lt.s32.totalorder %s27_s15, %s27_s15 }
   0xd   :  { %p473_p5 = scmp.ne.s32.totalorder %s27_s15, %s472_s19  ;;  %p478_p7 = scmp.lt.s32.totalorder %s472_s19, %s472_s19 }
   0xf   :  { %p479_p8 = por %p478_p7, %p477_p6 }
  0x11   :  { %p480_p9 = pnand %p479_p8, %p473_p5 }
  0x13   :  { %483 = shalt.err (!%p480_p9)
}
  0x14   :  { %s490_s20 = smov 128   ;;  %s491_s21 = smov 8  }
  0x15   :  { %32 = dma.hbm_to_vmem [thread:$0]  %s566_s1, 4224, %s27_s15, [#allocation5], %s490_s20, %s490_s20, %s491_s21  }
  0x16   :  { %484 = dma.done.wait [#allocation3], 128  }
  0x17   :  { %485 = vsyncadd [#allocation3], 4294967168 }
  0x18   :  { %486 = dma.done.wait [#allocation5], 4224  }
  0x19   :  { %487 = vsyncadd [#allocation5], 4294963072  ;;  %v492_v0 = vmov 0.0   ;;  %vm493_vm0 = vmmov 0   ;;  %vm73_vm1 = vcmask 64512   ;;  %v40_v1 = vld [vmem:[#allocation4] sm:$0xff]  ;;  %v291_v41 = vlaneseq }
  0x1a   :  { %363 = vmatprep.subr.mxu0 %v492_v0  ;;  %365 = vmatprep.mubr.msk.f32.mxu0 %vm493_vm0, %v492_v0  ;;  %v39_v2 = vld [vmem:[#allocation2] sm:$0xff]  ;;  %v56_v3 = vld [vmem:[#allocation4 + $0x80] sm:$0xff]  ;;  %v54_v5 = vld [vmem:[#allocation4 + $0x70] sm:$0xff]  ;;  %vm289_vm2 = vcmask 23552   ;;  %vm314_vm7 = vcmask 7168  }
  0x1b   :  { %368 = vmatprep.subr.mxu1 %v492_v0  ;;  %400 = vmatprep.mubr.msk.f32.mxu1 %vm493_vm0, %v492_v0  ;;  %v55_v4 = vld [vmem:[#allocation4 + $0x78] sm:$0xff]  ;;  %v53_v6 = vld [vmem:[#allocation4 + $0x68] sm:$0xff]  ;;  %v52_v7 = vld [vmem:[#allocation4 + $0x60] sm:$0xff]  ;;  %v292_v42 = vand.u32 127, %v291_v41 }
  0x1c   :  { %364 = vmatpush3.msra.mxu0 %v40_v1  ;;  %369 = vmatpush3.msra.mxu1 %v56_v3  ;;  %v51_v8 = vld [vmem:[#allocation4 + $0x58] sm:$0xff]  ;;  %v50_v9 = vld [vmem:[#allocation4 + $0x50] sm:$0xff]  ;;  %v49_v10 = vld [vmem:[#allocation4 + $0x48] sm:$0xff] }
  0x1d   :  { %366 = vmatmul.mubr.msk.f32.vlgmr.msra.gmra.mxu0 %vm73_vm1, %v39_v2  ;;  %370 = vmatprep.subr.mxu1 %v492_v0  ;;  %v48_v11 = vld [vmem:[#allocation4 + $0x40] sm:$0xff]  ;;  %v47_v12 = vld [vmem:[#allocation4 + $0x38] sm:$0xff]  ;;  %v46_v13 = vld [vmem:[#allocation4 + $0x30] sm:$0xff]  ;;  %vm293_vm3 = vcmp.lt.s32.totalorder %v292_v42, 3 }
  0x1e   :  { %371 = vmatpush3.msra.mxu1 %v55_v4  ;;  %403 = vmatprep.subr.mxu0 %v492_v0  ;;  %v45_v14 = vld [vmem:[#allocation4 + $0x28] sm:$0xff]  ;;  %v44_v15 = vld [vmem:[#allocation4 + $0x20] sm:$0xff]  ;;  %v43_v16 = vld [vmem:[#allocation4 + $0x18] sm:$0xff] }
  0x1f   :  { %372 = vmatprep.subr.mxu1 %v492_v0  ;;  %435 = vmatprep.mubr.msk.f32.mxu0 %vm493_vm0, %v492_v0  ;;  %v42_v17 = vld [vmem:[#allocation4 + $0x10] sm:$0xff]  ;;  %v41_v18 = vld [vmem:[#allocation4 + $0x8] sm:$0xff]  ;;  %v72_v19 = vld [vmem:[#allocation4 + $0x100] sm:$0xff] }
  0x20   :  { %373 = vmatpush3.msra.mxu1 %v54_v5  ;;  %v71_v20 = vld [vmem:[#allocation4 + $0xf8] sm:$0xff]  ;;  %404 = vmatpush3.msra.mxu0 %v72_v19  ;;  %v70_v21 = vld [vmem:[#allocation4 + $0xf0] sm:$0xff]  ;;  %v69_v22 = vld [vmem:[#allocation4 + $0xe8] sm:$0xff] }
  0x21   :  { %374 = vmatprep.subr.mxu1 %v492_v0  ;;  %405 = vmatprep.subr.mxu0 %v492_v0  ;;  %v68_v23 = vld [vmem:[#allocation4 + $0xe0] sm:$0xff]  ;;  %v67_v24 = vld [vmem:[#allocation4 + $0xd8] sm:$0xff]  ;;  %v66_v25 = vld [vmem:[#allocation4 + $0xd0] sm:$0xff] }
  0x22   :  { %375 = vmatpush3.msra.mxu1 %v53_v6  ;;  %406 = vmatpush3.msra.mxu0 %v71_v20  ;;  %v65_v26 = vld [vmem:[#allocation4 + $0xc8] sm:$0xff]  ;;  %v64_v27 = vld [vmem:[#allocation4 + $0xc0] sm:$0xff]  ;;  %v63_v28 = vld [vmem:[#allocation4 + $0xb8] sm:$0xff] }
  0x23   :  { %376 = vmatprep.subr.mxu1 %v492_v0  ;;  %407 = vmatprep.subr.mxu0 %v492_v0  ;;  %v62_v29 = vld [vmem:[#allocation4 + $0xb0] sm:$0xff]  ;;  %v61_v30 = vld [vmem:[#allocation4 + $0xa8] sm:$0xff]  ;;  %v60_v31 = vld [vmem:[#allocation4 + $0xa0] sm:$0xff] }
  0x24   :  { %377 = vmatpush3.msra.mxu1 %v52_v7  ;;  %408 = vmatpush3.msra.mxu0 %v70_v21  ;;  %v59_v32 = vld [vmem:[#allocation4 + $0x98] sm:$0xff]  ;;  %v58_v36 = vld [vmem:[#allocation4 + $0x90] sm:$0xff]  ;;  %v57_v37 = vld [vmem:[#allocation4 + $0x88] sm:$0xff] }
  0x25   :  { %378 = vmatprep.subr.mxu1 %v492_v0  ;;  %409 = vmatprep.subr.mxu0 %v492_v0 }
  0x26   :  { %379 = vmatpush3.msra.mxu1 %v51_v8  ;;  %410 = vmatpush3.msra.mxu0 %v69_v22 }
  0x27   :  { %380 = vmatprep.subr.mxu1 %v492_v0  ;;  %411 = vmatprep.subr.mxu0 %v492_v0 }
  0x28   :  { %381 = vmatpush3.msra.mxu1 %v50_v9  ;;  %412 = vmatpush3.msra.mxu0 %v68_v23 }
  0x29   :  { %382 = vmatprep.subr.mxu1 %v492_v0  ;;  %413 = vmatprep.subr.mxu0 %v492_v0 }
  0x2a   :  { %383 = vmatpush3.msra.mxu1 %v49_v10  ;;  %414 = vmatpush3.msra.mxu0 %v67_v24 }
  0x2b   :  { %384 = vmatprep.subr.mxu1 %v492_v0  ;;  %415 = vmatprep.subr.mxu0 %v492_v0 }
  0x2c   :  { %385 = vmatpush3.msra.mxu1 %v48_v11  ;;  %416 = vmatpush3.msra.mxu0 %v66_v25 }
  0x2d   :  { %386 = vmatprep.subr.mxu1 %v492_v0  ;;  %417 = vmatprep.subr.mxu0 %v492_v0 }
  0x2e   :  { %387 = vmatpush3.msra.mxu1 %v47_v12  ;;  %418 = vmatpush3.msra.mxu0 %v65_v26 }
  0x2f   :  { %388 = vmatprep.subr.mxu1 %v492_v0  ;;  %419 = vmatprep.subr.mxu0 %v492_v0 }
  0x30   :  { %389 = vmatpush3.msra.mxu1 %v46_v13  ;;  %420 = vmatpush3.msra.mxu0 %v64_v27 }
  0x31   :  { %390 = vmatprep.subr.mxu1 %v492_v0  ;;  %421 = vmatprep.subr.mxu0 %v492_v0 }
  0x32   :  { %391 = vmatpush3.msra.mxu1 %v45_v14  ;;  %422 = vmatpush3.msra.mxu0 %v63_v28 }
  0x33   :  { %392 = vmatprep.subr.mxu1 %v492_v0  ;;  %423 = vmatprep.subr.mxu0 %v492_v0 }
  0x34   :  { %393 = vmatpush3.msra.mxu1 %v44_v15  ;;  %424 = vmatpush3.msra.mxu0 %v62_v29 }
  0x35   :  { %394 = vmatprep.subr.mxu1 %v492_v0  ;;  %425 = vmatprep.subr.mxu0 %v492_v0 }
  0x36   :  { %395 = vmatpush3.msra.mxu1 %v43_v16  ;;  %426 = vmatpush3.msra.mxu0 %v61_v30 }
  0x37   :  { %396 = vmatprep.subr.mxu1 %v492_v0  ;;  %427 = vmatprep.subr.mxu0 %v492_v0 }
  0x38   :  { %397 = vmatpush3.msra.mxu1 %v42_v17  ;;  %428 = vmatpush3.msra.mxu0 %v60_v31 }
  0x39   :  { %398 = vmatprep.subr.mxu1 %v492_v0  ;;  %429 = vmatprep.subr.mxu0 %v492_v0 }
  0x3a   :  { %399 = vmatpush3.msra.mxu1 %v41_v18  ;;  %430 = vmatpush3.msra.mxu0 %v59_v32 }
  0x3b   :  { %431 = vmatprep.subr.mxu0 %v492_v0 }
  0x3c   :  { %432 = vmatpush3.msra.mxu0 %v58_v36 }
  0x3d   :  { %433 = vmatprep.subr.mxu0 %v492_v0 }
  0x3e   :  { %434 = vmatpush3.msra.mxu0 %v57_v37 }
  0xdd   :  { %v143_v33 = vpop.f32.mrf.mxu0 }
  0xde   :  { %v147_v34 = vmax.f32 %v143_v33, 0.0 }
  0xdf   :  { %v367_v35 = vpop.f32.mrf.mxu0 }
  0xe0   :  { %401 = vmatmul.mubr.f32.vlgmr.msra.gmra.mxu1 %v147_v34 }
 0x1a0   :  { %v214_v38 = vpop.f32.mrf.mxu1 }
 0x1a1   :  { %v218_v39 = vmax.f32 %v214_v38, 0.0 }
 0x1a2   :  { %v402_v40 = vpop.f32.mrf.mxu1 }
 0x1a3   :  { %436 = vmatmul.mubr.f32.vlgmr.msra.gmra.mxu0 %v218_v39 }
 0x263   :  { %v285_v43 = vpop.f32.mrf.mxu0 }
 0x264   :  { %290 = vst.msk [vmem:[%s567_s2] sm:$0xff] %vm289_vm2, %v285_v43  ;;  %v294_v44 = vsel %vm293_vm3, %v285_v43, -inf }
 0x265   :  { %295 = vmax.xlane.f32.xlu0 %v294_v44  ;;  %v437_v45 = vpop.f32.mrf.mxu0 }
 0x2ee   :  { %v296_v46 = vpop.xlane.xlu0 %295 }
 0x2ef   :  { %vm297_vm4 = vcmp.eq.f32.partialorder %v294_v44, %v296_v46 }
 0x2f0   :  { %vm298_vm5 = vmand %vm293_vm3, %vm297_vm4 }
 0x2f1   :  { %v299_v47 = vsel %vm298_vm5, %v292_v42, 128 }
 0x2f2   :  { %v301_v48 = vshra.s32 %v299_v47, 16  ;;  %v300_v50 = vand.u32 65535, %v299_v47 }
 0x2f4   :  { %v303_v49 = vcvt.s32.f32 %v301_v48  ;;  %v302_v52 = vcvt.s32.f32 %v300_v50 }
 0x2f6   :  { %304 = vmin.xlane.f32.xlu0 %v303_v49 }
 0x37f   :  { %v305_v51 = vpop.xlane.xlu0 %304 }
 0x380   :  { %vm306_vm6 = vcmp.eq.f32.partialorder %v303_v49, %v305_v51  ;;  %v311_v54 = vcvt.f32.s32 %v305_v51 }
 0x381   :  { %v307_v53 = vsel %vm306_vm6, %v302_v52, inf }
 0x382   :  { %308 = vmin.xlane.f32.xlu1 %v307_v53  ;;  %v312_v56 = vshll.u32 %v311_v54, 16 }
 0x40b   :  { %v309_v55 = vpop.xlane.xlu1 %308 }
 0x40c   :  { %v310_v57 = vcvt.f32.s32 %v309_v55 }
 0x40e   :  { %v313_v58 = vadd.s32 %v312_v56, %v310_v57 }
 0x410   :  { %315 = vst.msk [vmem:[%s568_s3] sm:$0xff] %vm314_vm7, %v313_v58 }
 0x411   :  { %324 = vsyncpa [#allocation3], 1 }
 0x412   :  { %325 = vsyncpa [#allocation5], 1 }

</bundles_post_ra>
